<compile_context>
chip_gen: v6e
topology: v6e:2x2x1
jax: 0.10.0
libtpu: 0.0.40
codegen_flags: <defaults>
</compile_context>

<pallas_src>
import jax
import jax.numpy as jnp
from jax.experimental import pallas as pl
from jax.experimental.pallas import tpu as pltpu


# ----------------------------------------------------------------------------
# Pallas kernel: sigmoid(1x1 conv C -> 1) over the whole (B, C, HW) tensor
# ----------------------------------------------------------------------------
def _ph_kernel(x_ref, w_ref, b_ref, o_ref):
    # x_ref : (B, C, HW) VMEM   (lanes = HW, sublanes = C)
    # w_ref : (1, C, 1)  VMEM   f32 conv weight column
    # b_ref : (1,)       SMEM   f32 conv bias
    # o_ref : (B, 1, HW) VMEM
    x = x_ref[...].astype(jnp.float32)                   # (B, C, HW), cast in-kernel
    w = w_ref[...]                                       # (1, C, 1) broadcast column

    # 1x1 conv C -> 1: dense broadcast multiply (VPU) + sublane reduce (XLU)
    z = jnp.sum(x * w, axis=1, keepdims=True) + b_ref[0]  # (B, 1, HW)

    # exact sigmoid with a single transcendental: sigmoid(z) = 0.5*tanh(0.5*z)+0.5
    sig = 0.5 * jnp.tanh(0.5 * z) + 0.5
    o_ref[...] = sig.astype(o_ref.dtype)


# ----------------------------------------------------------------------------
# wrapper
# ----------------------------------------------------------------------------
def ph_block_forward(x_nchw, weight, bias, scale_factor=1):
    """PH_Block forward.

    x_nchw : (B, C, H, W) activations (any float dtype)
    weight : (1, C, 1, 1) Conv2d weight (out_channels=1)
    bias   : (1,)         Conv2d bias
    """
    if scale_factor > 1:
        # TODO(synk): bilinear nn.Upsample (align_corners=True) for scale_factor > 1
        # is not implemented; only the default PH_Block configuration is supported.
        raise NotImplementedError("scale_factor > 1 not implemented")

    B, C, H, W = x_nchw.shape
    HW = H * W

    # lane-dense view: minor dim = H*W; pad to a multiple of 128 so stores are
    # unmasked full-lane vst (no-op at H=W=16 -> HW=256).
    pad = (-HW) % 128
    x = x_nchw.reshape(B, C, HW)
    if pad:
        x = jnp.pad(x, ((0, 0), (0, 0), (0, pad)))
    HWp = HW + pad

    w_col = weight.reshape(1, C, 1).astype(jnp.float32)
    b_vec = bias.reshape(1).astype(jnp.float32)

    out = pl.pallas_call(
        _ph_kernel,
        out_shape=jax.ShapeDtypeStruct((B, 1, HWp), x_nchw.dtype),
        in_specs=[
            pl.BlockSpec(memory_space=pltpu.MemorySpace.VMEM),   # x (whole tensor)
            pl.BlockSpec(memory_space=pltpu.MemorySpace.VMEM),   # weight column
            pl.BlockSpec(memory_space=pltpu.MemorySpace.SMEM),   # bias scalar
        ],
        out_specs=pl.BlockSpec(memory_space=pltpu.MemorySpace.VMEM),
    )(x, w_col, b_vec)

    return out[:, :, :HW].reshape(B, 1, H, W)


# ----------------------------------------------------------------------------
# pure-JAX reference for verification
# ----------------------------------------------------------------------------
def ph_block_reference(x_nchw, weight, bias):
    B, C, H, W = x_nchw.shape
    z = jnp.einsum(
        "bchw,c->bhw", x_nchw.astype(jnp.float32), weight.reshape(C).astype(jnp.float32)
    ) + bias.astype(jnp.float32)[0]
    return jax.nn.sigmoid(z)[:, None, :, :].astype(x_nchw.dtype)


# ----------------------------------------------------------------------------
if __name__ == "__main__":
    B, C, H, W = 2, 4, 16, 16
    key = jax.random.PRNGKey(0)
    kx, kw, kb = jax.random.split(key, 3)
    x = jax.random.normal(kx, (B, C, H, W), dtype=jnp.float32)
    weight = jax.random.normal(kw, (1, C, 1, 1), dtype=jnp.float32) * 0.5
    bias = jax.random.normal(kb, (1,), dtype=jnp.float32) * 0.1

    out = jax.block_until_ready(ph_block_forward(x, weight, bias))
    ref = jax.block_until_ready(ph_block_reference(x, weight, bias))

    assert out.shape == (B, 1, H, W)
    # exact (tanh-form) sigmoid: tight tolerance
    assert jnp.allclose(out, ref, atol=1e-5, rtol=1e-5), "kernel/reference mismatch"
    print("KERNEL_OK")
</pallas_src>

<mosaic_0001>
module attributes {stable_mosaic.version = 11 : i64} {
  func.func @_ph_kernel(%arg0: memref<2x4x256xf32, #tpu.memory_space<vmem>>, %arg1: memref<1x4x1xf32, #tpu.memory_space<vmem>>, %arg2: memref<1xf32, #tpu.memory_space<smem>>, %arg3: memref<2x1x256xf32, #tpu.memory_space<vmem>>) attributes {dimension_semantics = [], scalar_prefetch = 0 : i64, scratch_operands = 0 : i64, tpu.core_type = #tpu.core_type<tc>} {
    %c0 = arith.constant 0 : index
    %c0_0 = arith.constant 0 : index
    %c0_1 = arith.constant 0 : index
    %0 = vector.load %arg0[%c0, %c0_0, %c0_1] : memref<2x4x256xf32, #tpu.memory_space<vmem>>, vector<2x4x256xf32>
    %c0_2 = arith.constant 0 : index
    %c0_3 = arith.constant 0 : index
    %c0_4 = arith.constant 0 : index
    %1 = vector.load %arg1[%c0_2, %c0_3, %c0_4] : memref<1x4x1xf32, #tpu.memory_space<vmem>>, vector<1x4x1xf32>
    %2 = vector.broadcast %1 : vector<1x4x1xf32> to vector<2x4x256xf32>
    %3 = arith.mulf %0, %2 : vector<2x4x256xf32>
    %cst = arith.constant dense<0.000000e+00> : vector<2x256xf32>
    %4 = vector.multi_reduction <add>, %3, %cst [1] : vector<2x4x256xf32> to vector<2x256xf32>
    %5 = vector.shape_cast %4 : vector<2x256xf32> to vector<2x1x256xf32>
    %c0_5 = arith.constant 0 : index
    %6 = memref.load %arg2[%c0_5] : memref<1xf32, #tpu.memory_space<smem>>
    %7 = vector.broadcast %6 : f32 to vector<2x1x256xf32>
    %8 = arith.addf %5, %7 : vector<2x1x256xf32>
    %cst_6 = arith.constant 5.000000e-01 : f32
    %9 = vector.broadcast %cst_6 : f32 to vector<2x1x256xf32>
    %10 = arith.mulf %9, %8 : vector<2x1x256xf32>
    %11 = math.tanh %10 : vector<2x1x256xf32>
    %cst_7 = arith.constant 5.000000e-01 : f32
    %12 = vector.broadcast %cst_7 : f32 to vector<2x1x256xf32>
    %13 = arith.mulf %12, %11 : vector<2x1x256xf32>
    %cst_8 = arith.constant 5.000000e-01 : f32
    %14 = vector.broadcast %cst_8 : f32 to vector<2x1x256xf32>
    %15 = arith.addf %13, %14 : vector<2x1x256xf32>
    %c0_9 = arith.constant 0 : index
    %c0_10 = arith.constant 0 : index
    %c0_11 = arith.constant 0 : index
    %16 = vector.load %arg3[%c0_9, %c0_10, %c0_11] : memref<2x1x256xf32, #tpu.memory_space<vmem>>, vector<2x1x256xf32>
    tpu.vector_store %arg3[%c0_9, %c0_10, %c0_11], %15 {strides = array<i32>} : memref<2x1x256xf32, #tpu.memory_space<vmem>>, vector<2x1x256xf32>,
    return
  }
}

</mosaic_0001>

<bundles_post_ra>
// kernel: tpu_custom_call.1
= control target key start
LH: loop header
LB: loop body
LE: loop exit
PB: predicated region body
PF: predicated region fallthrough
CT: control target
= control target key end

     0   :  { %9 = vsyncpa [#allocation4], 0  ;;  %s272_s0 = inlined_call_operand.hbm [shape: f32[2,4,256], index: 0, kind: input, shape index: {}]   ;;  %s273_s1 = inlined_call_operand.vmem [shape: f32[1,4,1], index: 1, kind: input, shape index: {}]   ;;  %s274_s2 = inlined_call_operand.<no memory space> [shape: f32[1], index: 2, kind: input, shape index: {}]   ;;  %s275_s3 = inlined_call_operand.hbm [shape: f32[2,1,256], index: 3, kind: output, shape index: {}]  }
   0x1   :  { %10 = vsyncpa [#allocation5], 0  ;;  %s225_s12 = smov [#allocation3]  }
   0x2   :  { %s16_s13 = sshll.u32 %s225_s12, 4  ;;  %s17_s13 = int_to_ptr.vmem [resolvable:$true] %s16_s13 }
   0x3   :  { %s189_s14 = scalar_lea.vmem %s17_s13, 256  ;;  %p194_p1 = scmp.lt.s32.totalorder %s17_s13, %s17_s13 }
   0x4   :  { %p190_p0 = scmp.ne.s32.totalorder %s17_s13, %s189_s14  ;;  %p195_p2 = scmp.lt.s32.totalorder %s189_s14, %s189_s14 }
   0x6   :  { %p196_p3 = por %p195_p2, %p194_p1 }
   0x8   :  { %p197_p4 = pnand %p196_p3, %p190_p0 }
   0xa   :  { %200 = shalt.err (!%p197_p4)
}
   0xb   :  { %s226_s15 = smov 128   ;;  %s227_s16 = smov 8  }
   0xc   :  { %22 = dma.hbm_to_vmem [thread:$0]  %s272_s0, 256, %s17_s13, [#allocation4], %s226_s15, %s226_s15, %s227_s16  }
   0xd   :  { %221 = dma.done.wait [#allocation4], 256  }
   0xe   :  { %222 = vsyncadd [#allocation4], 4294967040  ;;  %v228_v0 = vmov 0   ;;  %v32_v1 = vld [vmem:[%s273_s1] sm:$0xf]  ;;  %v40_v4 = vlaneseq  ;;  %v31_v10 = vld [vmem:[#allocation3 + $0x8] sm:$0xff]  ;;  %v83_v38 = vstv %s274_s2 }
   0xf   :  { %172 = vset.pattern.permute.xlu0 %v228_v0  ;;  %v229_v2 = vmov 839922192   ;;  %v30_v9 = vld [vmem:[#allocation3] sm:$0xff]  ;;  %vm53_vm0 = vcmask 1043456   ;;  %v230_v53 = vmov 1966171168  }
  0x10   :  { %35 = vperm.xlu0 %172, %v32_v1   ;;  %v38_v3 = vunpack.c.l.s4 %v229_v2  ;;  %v261_v6 = vshrl.u32 %v40_v4, 7  ;;  %v110_v54 = vunpack.c.l.s4 %v230_v53  ;;  %s231_s2 = smov [#allocation6]   ;;  %vm142_vm1 = vcmp.lt.s32.totalorder %v40_v4, 256 }
  0x11   :  { %s151_s21 = sshll.u32 %s231_s2, 4  ;;  %s152_s21 = int_to_ptr.vmem [resolvable:$true] %s151_s21 }
  0x12   :  { %v39_v5 = vunpack.c.0.s8 %v38_v3  ;;  %v111_v57 = vunpack.c.0.s8 %v110_v54  ;;  %s201_s22 = scalar_lea.vmem %s152_s21, 64  ;;  %p206_p6 = scmp.lt.s32.totalorder %s152_s21, %s152_s21 }
  0x13   :  { %p202_p5 = scmp.ne.s32.totalorder %s152_s21, %s201_s22  ;;  %p207_p7 = scmp.lt.s32.totalorder %s201_s22, %s201_s22 }
  0x14   :  { %v42_v7 = vsub.s32 %v39_v5, %v261_v6  ;;  %v114_v0 = vsub.s32 %v111_v57, %v261_v6 }
  0x15   :  { %p208_p8 = por %p207_p7, %p206_p6 }
  0x17   :  { %p209_p9 = pnand %p208_p8, %p202_p5 }
  0x8b   :  { %v36_v8 = vpop.permute.xlu0 %35 }
  0x8c   :  { %v43_v11 = vrot.slane %v36_v8, %v42_v7 }
  0x8e   :  { %v45_v12 = vmul.f32 %v43_v11, %v30_v9  ;;  %v46_v13 = vmul.f32 %v43_v11, %v31_v10 }
  0x90   :  { %v49_v14 = vcombine.high %v45_v12, %v45_v12  ;;  %v50_v15 = vcombine.high %v46_v13, %v46_v13  ;;  %v54_v16 = vsel %vm53_vm0, %v45_v12, 0.0  ;;  %v68_v17 = vsel %vm53_vm0, %v46_v13, 0.0 }
  0x91   :  { %v55_v18 = vrot.slane %v54_v16, 4  ;;  %v69_v19 = vrot.slane %v68_v17, 4 }
  0x92   :  { %v61_v20 = vsel %vm53_vm0, %v49_v14, 0.0  ;;  %v75_v21 = vsel %vm53_vm0, %v50_v15, 0.0 }
  0x93   :  { %v56_v22 = vadd.f32 %v55_v18, %v54_v16  ;;  %v62_v23 = vrot.slane %v61_v20, 4  ;;  %v70_v24 = vadd.f32 %v69_v19, %v68_v17  ;;  %v76_v25 = vrot.slane %v75_v21, 4 }
  0x95   :  { %v57_v26 = vrot.slane %v56_v22, 2  ;;  %v63_v27 = vadd.f32 %v62_v23, %v61_v20  ;;  %v71_v28 = vrot.slane %v70_v24, 2  ;;  %v77_v29 = vadd.f32 %v76_v25, %v75_v21 }
  0x97   :  { %v58_v30 = vadd.f32 %v57_v26, %v56_v22  ;;  %v64_v31 = vrot.slane %v63_v27, 2  ;;  %v72_v32 = vadd.f32 %v71_v28, %v70_v24  ;;  %v78_v33 = vrot.slane %v77_v29, 2 }
  0x99   :  { %v59_v34 = vrot.slane %v58_v30, 1  ;;  %v65_v35 = vadd.f32 %v64_v31, %v63_v27  ;;  %v73_v36 = vrot.slane %v72_v32, 1  ;;  %v79_v37 = vadd.f32 %v78_v33, %v77_v29 }
  0x9b   :  { %v60_v39 = vadd.f32 %v59_v34, %v58_v30  ;;  %v66_v40 = vrot.slane %v65_v35, 1  ;;  %v74_v41 = vadd.f32 %v73_v36, %v72_v32  ;;  %v80_v42 = vrot.slane %v79_v37, 1 }
  0x9d   :  { %v67_v43 = vadd.f32 %v66_v40, %v65_v35  ;;  %v81_v44 = vadd.f32 %v80_v42, %v79_v37  ;;  %v84_v45 = vadd.f32 %v83_v38, %v60_v39  ;;  %v86_v46 = vadd.f32 %v83_v38, %v74_v41 }
  0x9f   :  { %v85_v47 = vadd.f32 %v83_v38, %v67_v43  ;;  %v87_v48 = vadd.f32 %v83_v38, %v81_v44  ;;  %v88_v49 = vmul.f32 0.5, %v84_v45  ;;  %v90_v50 = vmul.f32 0.5, %v86_v46 }
  0xa1   :  { %v89_v51 = vmul.f32 0.5, %v85_v47  ;;  %v91_v52 = vmul.f32 0.5, %v87_v48  ;;  %173 = vtanh.f32 %v88_v49 }
  0xa2   :  { %175 = vtanh.f32 %v90_v50 }
  0xa3   :  { %177 = vtanh.f32 %v89_v51 }
  0xa4   :  { %179 = vtanh.f32 %v91_v52 }
  0xae   :  { %v174_v55 = vpop.eup %173 }
  0xaf   :  { %v176_v56 = vpop.eup %175  ;;  %v96_v58 = vmul.f32 0.5, %v174_v55 }
  0xb0   :  { %v178_v59 = vpop.eup %177  ;;  %v98_v60 = vmul.f32 0.5, %v176_v56 }
  0xb1   :  { %v180_v61 = vpop.eup %179  ;;  %v97_v62 = vmul.f32 0.5, %v178_v59  ;;  %v100_v1 = vadd.f32 0.5, %v96_v58 }
  0xb2   :  { %v99_v63 = vmul.f32 0.5, %v180_v61  ;;  %v102_v3 = vadd.f32 0.5, %v98_v60 }
  0xb3   :  { %v101_v2 = vadd.f32 0.5, %v97_v62 }
  0xb4   :  { %v103_v5 = vadd.f32 0.5, %v99_v63 }
  0xb5   :  { %v108_v7 = vcombine.low %v100_v1, %v101_v2 }
  0xb6   :  { %v123_v8 = vcombine.low %v102_v3, %v103_v5 }
  0xb7   :  { %v115_v9 = vrot.slane %v108_v7, %v114_v0 }
  0xb8   :  { %v130_v10 = vrot.slane %v123_v8, %v114_v0 }
  0xb9   :  { %v122_v11 = vrot.slane %v115_v9, %v114_v0 }
  0xba   :  { %v137_v12 = vrot.slane %v130_v10, %v114_v0 }
  0xbb   :  { %144 = vst.msk [vmem:[#allocation6] sm:$0x3] %vm142_vm1, %v122_v11 }
  0xbc   :  { %145 = vst.msk [vmem:[#allocation6 + $0x2] sm:$0x3] %vm142_vm1, %v137_v12 }
  0xbd   :  { %212 = shalt.err (!%p209_p9)
}
  0xbe   :  { %s232_s23 = smov 32   ;;  %s233_s24 = smov 2  }
  0xbf   :  { %157 = dma.vmem_to_hbm [thread:$0]  %s152_s21, 64, %s275_s3, [#allocation5], %s232_s23, %s232_s23, %s233_s24  }
  0xc0   :  { %223 = dma.done.wait [#allocation5], 64  }
  0xc1   :  { %224 = vsyncadd [#allocation5], 4294967232 }
  0xc2   :  { %161 = vsyncpa [#allocation4], 1 }
  0xc3   :  { %162 = vsyncpa [#allocation5], 1 }

</bundles_post_ra>
